<compile_context>
chip_gen: v7x
topology: tpu7x:2x2x1
jax: 0.10.0
libtpu: 0.0.40
codegen_flags: <defaults>
</compile_context>

<pallas_src>
from functools import partial

import jax
import jax.numpy as jnp
from jax.experimental import pallas as pl
from jax.experimental.pallas import tpu as pltpu


def _mlp_kernel(x_ref, p_ref, o_ref, *, d_in, n_actions):
    lanes = p_ref.shape[1]                                   # 128 (hidden width)

    x = x_ref[...]                                           # (TB, d_in) f32
    w1 = p_ref[0:d_in, :]                                    # (d_in, 128)
    b1 = p_ref[d_in:d_in + 1, :]                             # (1, 128)
    w2 = p_ref[d_in + 1:d_in + 1 + lanes, :]                 # (128, 128), cols >= A are zero
    b2 = p_ref[d_in + 1 + lanes:d_in + 2 + lanes, :]         # (1, 128),  lanes >= A are zero

    # ---- fc1 + ReLU on the MXU (K = d_in is tiny but the MXU slot has slack) ----
    h = jnp.dot(x, w1, preferred_element_type=jnp.float32) + b1
    h = jnp.maximum(h, 0.0)                                  # (TB, 128)

    # ---- fc2 on the MXU: lane-dense (TB, 128) result, full-width bias add ----
    out = jnp.dot(h, w2, preferred_element_type=jnp.float32) + b2

    # ---- single-store epilogue: write (TB, n_actions) directly, no zero-fill ----
    o_ref[...] = out[:, :n_actions].astype(o_ref.dtype)


def pack_params(w1, b1, w2, b2):
    """Pack (w1:(d_in,H), b1:(1,H), w2:(H,A), b2:(1,A)) into one (8k, H) f32 slab."""
    d_in, hidden = w1.shape
    n_actions = w2.shape[1]
    rows = d_in + 1 + hidden + 1                             # w1 rows + b1 + w2_pad rows + b2
    padded_rows = ((rows + 7) // 8) * 8                      # = 136 for (4, 128, 2)
    slab = jnp.zeros((padded_rows, hidden), jnp.float32)
    slab = slab.at[0:d_in, :].set(w1)
    slab = slab.at[d_in, :].set(b1.reshape(hidden))
    slab = slab.at[d_in + 1:d_in + 1 + hidden, 0:n_actions].set(w2)      # zero-padded to 128 cols
    slab = slab.at[d_in + 1 + hidden, 0:n_actions].set(b2.reshape(n_actions))
    return slab


def linear_deep_network_forward(state, params, n_actions, *, block_b=None):
    """state: (B, d_in) f32; params: packed slab from pack_params(). Returns (B, n_actions)."""
    B, d_in = state.shape

    if block_b is None:
        # grid=(1,) for realistic DQN batches; split in two only when per-core work
        # comfortably exceeds the ~0.35 us grid-step overhead (lets v7x use both TCs).
        if B >= 512 and B % 2 == 0 and (B // 2) % 8 == 0:
            block_b = B // 2
        else:
            block_b = B
    if B % block_b != 0:
        # TODO(synk): mask the tail batch tile for non-divisible B instead of requiring divisibility.
        raise ValueError("B must be a multiple of block_b")
    if block_b != B and block_b % 8 != 0:
        raise ValueError("block_b must be a multiple of 8 (or equal to B) for TPU tiling")
    grid = (B // block_b,)

    return pl.pallas_call(
        partial(_mlp_kernel, d_in=d_in, n_actions=n_actions),
        out_shape=jax.ShapeDtypeStruct((B, n_actions), jnp.float32),
        grid_spec=pltpu.PrefetchScalarGridSpec(
            num_scalar_prefetch=0,
            grid=grid,
            in_specs=[
                pl.BlockSpec((block_b, d_in), lambda i: (i, 0)),   # activations, tiled over batch
                pl.BlockSpec(params.shape, lambda i: (0, 0)),      # weight slab resident across grid
            ],
            out_specs=pl.BlockSpec((block_b, n_actions), lambda i: (i, 0)),
        ),
        compiler_params=pltpu.CompilerParams(
            dimension_semantics=("parallel",)),                # batch axis shards across TCs (v7x)
    )(state, params)


def init_params(key, input_dim, hidden, n_actions):
    """Deterministic init mimicking nn.Linear default: U(-1/sqrt(fan_in), 1/sqrt(fan_in))."""
    k1, k2, k3, k4 = jax.random.split(key, 4)
    bound1 = 1.0 / jnp.sqrt(jnp.float32(input_dim))
    bound2 = 1.0 / jnp.sqrt(jnp.float32(hidden))
    w1 = jax.random.uniform(k1, (input_dim, hidden), jnp.float32, -bound1, bound1)
    b1 = jax.random.uniform(k2, (1, hidden), jnp.float32, -bound1, bound1)
    w2 = jax.random.uniform(k3, (hidden, n_actions), jnp.float32, -bound2, bound2)
    b2 = jax.random.uniform(k4, (1, n_actions), jnp.float32, -bound2, bound2)
    return w1, b1, w2, b2


if __name__ == "__main__":
    # CartPole: observation dim = 4, n_actions = 2, hidden = 128 (from module __init__).
    D_IN, HIDDEN, N_ACTIONS = 4, 128, 2

    key = jax.random.PRNGKey(0)
    k_x, k_p, k_x2, k_x3 = jax.random.split(key, 4)
    w1, b1, w2, b2 = init_params(k_p, D_IN, HIDDEN, N_ACTIONS)
    params = pack_params(w1, b1, w2, b2)

    def ref_forward(x):
        return jnp.maximum(x @ w1 + b1, 0.0) @ w2 + b2

    # (1) act() path: small batch of env states, grid=(1,).
    state = jax.random.normal(k_x, (8, D_IN), jnp.float32)
    actions = jax.block_until_ready(
        linear_deep_network_forward(state, params, N_ACTIONS))
    assert actions.shape == (8, N_ACTIONS)
    assert jnp.allclose(actions, ref_forward(state), atol=1e-4, rtol=1e-4)

    # (2) replay-buffer path: B=128 stays a single block (grid=(1,)).
    big_state = jax.random.normal(k_x2, (128, D_IN), jnp.float32)
    big_actions = jax.block_until_ready(
        linear_deep_network_forward(big_state, params, N_ACTIONS))
    assert big_actions.shape == (128, N_ACTIONS)
    assert jnp.allclose(big_actions, ref_forward(big_state), atol=1e-4, rtol=1e-4)

    # (3) large offline-eval batch: auto-splits into 2 batch tiles ("parallel" -> 2 TCs on v7x).
    huge_state = jax.random.normal(k_x3, (1024, D_IN), jnp.float32)
    huge_actions = jax.block_until_ready(
        linear_deep_network_forward(huge_state, params, N_ACTIONS))
    assert huge_actions.shape == (1024, N_ACTIONS)
    assert jnp.allclose(huge_actions, ref_forward(huge_state), atol=1e-4, rtol=1e-4)

    print("KERNEL_OK")
</pallas_src>

<mosaic_0001>
module attributes {stable_mosaic.version = 11 : i64} {
  func.func @_mlp_kernel(%arg0: i32, %arg1: memref<8x4xf32, #tpu.memory_space<vmem>>, %arg2: memref<136x128xf32, #tpu.memory_space<vmem>>, %arg3: memref<8x2xf32, #tpu.memory_space<vmem>>) attributes {dimension_semantics = [#tpu.dimension_semantics<parallel>], iteration_bounds = array<i64: 1>, scalar_prefetch = 0 : i64, scratch_operands = 0 : i64, tpu.core_type = #tpu.core_type<tc>, window_params = [{transform_indices = @transform_0, window_bounds = array<i64: 8, 4>}, {pipeline_mode = #tpu.pipeline_mode<synchronous>, transform_indices = @transform_1, window_bounds = array<i64: 136, 128>}, {transform_indices = @transform_2, window_bounds = array<i64: 8, 2>}]} {
    %c0 = arith.constant 0 : index
    %c0_0 = arith.constant 0 : index
    %0 = vector.load %arg1[%c0, %c0_0] : memref<8x4xf32, #tpu.memory_space<vmem>>, vector<8x4xf32>
    %c0_1 = arith.constant 0 : index
    %c0_2 = arith.constant 0 : index
    %1 = vector.load %arg2[%c0_1, %c0_2] : memref<136x128xf32, #tpu.memory_space<vmem>>, vector<4x128xf32>
    %c4 = arith.constant 4 : index
    %c0_3 = arith.constant 0 : index
    %2 = vector.load %arg2[%c4, %c0_3] : memref<136x128xf32, #tpu.memory_space<vmem>>, vector<1x128xf32>
    %c5 = arith.constant 5 : index
    %c0_4 = arith.constant 0 : index
    %3 = vector.load %arg2[%c5, %c0_4] : memref<136x128xf32, #tpu.memory_space<vmem>>, vector<128x128xf32>
    %c133 = arith.constant 133 : index
    %c0_5 = arith.constant 0 : index
    %4 = vector.load %arg2[%c133, %c0_5] : memref<136x128xf32, #tpu.memory_space<vmem>>, vector<1x128xf32>
    %cst = arith.constant dense<0.000000e+00> : vector<8x128xf32>
    %5 = tpu.matmul %0, %1, %cst {dimension_numbers = #tpu.dot_dimension_numbers<[1], [0], [0], [1], [0, 0, 1, 1], [], []>} : vector<8x4xf32>, vector<4x128xf32>, vector<8x128xf32> -> vector<8x128xf32>
    %6 = vector.broadcast %2 : vector<1x128xf32> to vector<8x128xf32>
    %7 = arith.addf %5, %6 : vector<8x128xf32>
    %cst_6 = arith.constant 0.000000e+00 : f32
    %8 = vector.broadcast %cst_6 : f32 to vector<8x128xf32>
    %9 = arith.maximumf %7, %8 : vector<8x128xf32>
    %cst_7 = arith.constant dense<0.000000e+00> : vector<8x128xf32>
    %10 = tpu.matmul %9, %3, %cst_7 {dimension_numbers = #tpu.dot_dimension_numbers<[1], [0], [0], [1], [0, 0, 1, 1], [], []>} : vector<8x128xf32>, vector<128x128xf32>, vector<8x128xf32> -> vector<8x128xf32>
    %11 = vector.broadcast %4 : vector<1x128xf32> to vector<8x128xf32>
    %12 = arith.addf %10, %11 : vector<8x128xf32>
    %13 = vector.extract_strided_slice %12 {offsets = [0, 0], sizes = [8, 2], strides = [1, 1]} : vector<8x128xf32> to vector<8x2xf32>
    %c0_8 = arith.constant 0 : index
    %c0_9 = arith.constant 0 : index
    %14 = vector.load %arg3[%c0_8, %c0_9] : memref<8x2xf32, #tpu.memory_space<vmem>>, vector<8x2xf32>
    tpu.vector_store %arg3[%c0_8, %c0_9], %13 {strides = array<i32>} : memref<8x2xf32, #tpu.memory_space<vmem>>, vector<8x2xf32>,
    return
  }
  func.func @transform_0(%arg0: i32) -> (i32, i32) {
    %c0_i32 = arith.constant 0 : i32
    %c0_i32_0 = arith.constant 0 : i32
    return %arg0, %c0_i32 : i32, i32
  }
  func.func @transform_1(%arg0: i32) -> (i32, i32) {
    %c0_i32 = arith.constant 0 : i32
    %c0_i32_0 = arith.constant 0 : i32
    %c0_i32_1 = arith.constant 0 : i32
    return %c0_i32, %c0_i32_0 : i32, i32
  }
  func.func @transform_2(%arg0: i32) -> (i32, i32) {
    %c0_i32 = arith.constant 0 : i32
    %c0_i32_0 = arith.constant 0 : i32
    return %arg0, %c0_i32 : i32, i32
  }
}

</mosaic_0001>

<bundles_post_ra>
// kernel: tpu_custom_call.1
= control target key start
LH: loop header
LB: loop body
LE: loop exit
PB: predicated region body
PF: predicated region fallthrough
CT: control target
= control target key end

     0   :  { %7 = vsyncpa [#allocation3], 0  ;;  %s326_s9 = smov [#allocation2]   ;;  %s365_s0 = inlined_call_operand.vmem [shape: f32[8,4], index: 0, kind: input, shape index: {}]   ;;  %s366_s1 = inlined_call_operand.hbm [shape: f32[136,128], index: 1, kind: input, shape index: {}]   ;;  %s367_s2 = inlined_call_operand.vmem [shape: f32[8,2], index: 2, kind: output, shape index: {}]  }
   0x1   :  { %s15_s10 = sshll.u32 %s326_s9, 4  ;;  %s302_s13 = scalar_lea.hbm %s366_s1, 2176  ;;  %s16_s10 = int_to_ptr.vmem [resolvable:$true] %s15_s10 }
   0x2   :  { %p303_p0 = scmp.ne.s32.totalorder %s366_s1, %s302_s13  ;;  %p306_p1 = scmp.lt.u32.totalorder %s302_s13, %s366_s1 }
   0x4   :  { %p308_p2 = pnand %p306_p1, %p303_p0 }
   0x6   :  { %311 = shalt.err (!%p308_p2)
}
   0x7   :  { %s312_s18 = scalar_lea.vmem %s16_s10, 2176  ;;  %p317_p4 = scmp.lt.s32.totalorder %s16_s10, %s16_s10 }
   0x8   :  { %p313_p3 = scmp.ne.s32.totalorder %s16_s10, %s312_s18  ;;  %p318_p5 = scmp.lt.s32.totalorder %s312_s18, %s312_s18 }
   0xa   :  { %p319_p6 = por %p318_p5, %p317_p4 }
   0xc   :  { %p320_p7 = pnand %p319_p6, %p313_p3 }
   0xe   :  { %323 = shalt.err (!%p320_p7)
}
   0xf   :  { %s327_s19 = smov 128   ;;  %s328_s20 = smov 8  }
  0x10   :  { %21 = dma.hbm_to_vmem [thread:$0]  %s366_s1, 2176, %s16_s10, [#allocation3], %s327_s19, %s327_s19, %s328_s20  }
  0x11   :  { %324 = dma.done.wait [#allocation3], 2176  }
  0x12   :  { %325 = vsyncadd [#allocation3], 4294965120  ;;  %v329_v0 = vmov 0.0   ;;  %vm330_vm0 = vmmov 0   ;;  %v331_v1 = vmov 0.0|0.0   ;;  %vm53_vm1 = vcmask 1043456  }
  0x13   :  { %232 = vmatprep.subr.mxu0 %v329_v0  ;;  %234 = vmatprep.mubr.msk.f32.mxu0 %vm330_vm0, %v329_v0  ;;  %vm49_vm2 = vcmask 31744   ;;  %v26_v2 = vld [vmem:[#allocation2] sm:$0xf]  ;;  %v28_v4 = vld [vmem:[#allocation2 + $0x5] sm:$0xff]  ;;  %v29_v5 = vld [vmem:[#allocation2 + $0xd] sm:$0xff]  ;;  %vm202_vm3 = vcmask 15360  }
  0x14   :  { %272 = vmatprep.subr.bf16.mxu1 %v331_v1  ;;  %269 = vmatprep.mubr.msk.f32.mxu1 %vm330_vm0, %v329_v0  ;;  %v25_v3 = vld [vmem:[%s365_s0] sm:$0xff]  ;;  %v30_v6 = vld [vmem:[#allocation2 + $0x15] sm:$0xff]  ;;  %v273_v8 = vpack.c.bf16 %v29_v5, %v28_v4  ;;  %v33_v11 = vld [vmem:[#allocation2 + $0x2d] sm:$0xff] }
  0x15   :  { %233 = vmatpush3.msk.msra.mxu0 %vm53_vm1, %v26_v2  ;;  %v31_v7 = vld [vmem:[#allocation2 + $0x1d] sm:$0xff]  ;;  %v32_v10 = vld [vmem:[#allocation2 + $0x25] sm:$0xff]  ;;  %v34_v13 = vld [vmem:[#allocation2 + $0x35] sm:$0xff] }
  0x16   :  { %235 = vmatmul.mubr.msk.f32.vlgmr.msra.gmra.mrb[0].mxu0 %vm49_vm2, %v25_v3  ;;  %274 = vmatpush3.bf16.msra.mxu1 %v273_v8  ;;  %v276_v9 = vpack.c.bf16 %v31_v7, %v30_v6  ;;  %v279_v12 = vpack.c.bf16 %v33_v11, %v32_v10  ;;  %v35_v14 = vld [vmem:[#allocation2 + $0x3d] sm:$0xff]  ;;  %v36_v16 = vld [vmem:[#allocation2 + $0x45] sm:$0xff]  ;;  %v37_v17 = vld [vmem:[#allocation2 + $0x4d] sm:$0xff] }
  0x17   :  { %275 = vmatprep.subr.bf16.mxu1 %v331_v1  ;;  %v282_v15 = vpack.c.bf16 %v35_v14, %v34_v13  ;;  %v285_v18 = vpack.c.bf16 %v37_v17, %v36_v16  ;;  %v38_v19 = vld [vmem:[#allocation2 + $0x55] sm:$0xff]  ;;  %v39_v20 = vld [vmem:[#allocation2 + $0x5d] sm:$0xff]  ;;  %v40_v22 = vld [vmem:[#allocation2 + $0x65] sm:$0xff] }
  0x18   :  { %v288_v21 = vpack.c.bf16 %v39_v20, %v38_v19  ;;  %v41_v23 = vld [vmem:[#allocation2 + $0x6d] sm:$0xff]  ;;  %v42_v25 = vld [vmem:[#allocation2 + $0x75] sm:$0xff]  ;;  %v43_v26 = vld [vmem:[#allocation2 + $0x7d] sm:$0xff] }
  0x19   :  { %v291_v24 = vpack.c.bf16 %v41_v23, %v40_v22  ;;  %v294_v27 = vpack.c.bf16 %v43_v26, %v42_v25  ;;  %v209_v28 = vld [vmem:[#allocation2 + $0x4] ss:$0 sm:$0xff]  ;;  %v212_v33 = vld [vmem:[#allocation2 + $0x85] ss:$0 sm:$0xff] }
  0x1a   :  { %277 = vmatpush3.bf16.msra.mxu1 %v276_v9 }
  0x1b   :  { %278 = vmatprep.subr.bf16.mxu1 %v331_v1 }
  0x1e   :  { %280 = vmatpush3.bf16.msra.mxu1 %v279_v12 }
  0x1f   :  { %281 = vmatprep.subr.bf16.mxu1 %v331_v1 }
  0x22   :  { %283 = vmatpush3.bf16.msra.mxu1 %v282_v15 }
  0x23   :  { %284 = vmatprep.subr.bf16.mxu1 %v331_v1 }
  0x26   :  { %286 = vmatpush3.bf16.msra.mxu1 %v285_v18 }
  0x27   :  { %287 = vmatprep.subr.bf16.mxu1 %v331_v1 }
  0x2a   :  { %289 = vmatpush3.bf16.msra.mxu1 %v288_v21 }
  0x2b   :  { %290 = vmatprep.subr.bf16.mxu1 %v331_v1 }
  0x2e   :  { %292 = vmatpush3.bf16.msra.mxu1 %v291_v24 }
  0x2f   :  { %293 = vmatprep.subr.bf16.mxu1 %v331_v1 }
  0x32   :  { %295 = vmatpush3.bf16.msra.mxu1 %v294_v27 }
  0xe9   :  { %v123_v29 = vpop.f32.mrb[0].mxu0 }
  0xea   :  { %v124_v30 = vadd.f32 %v209_v28, %v123_v29  ;;  %v236_v31 = vpop.f32.mrb[1].mxu0 }
  0xec   :  { %v127_v32 = vmax.f32 %v124_v30, 0.0 }
  0xee   :  { %270 = vmatmul.mubr.f32.vlgmr.msra.gmra.mrb[0].mxu1 %v127_v32 }
 0x1c1   :  { %v198_v34 = vpop.f32.mrb[0].mxu1 }
 0x1c2   :  { %v199_v35 = vadd.f32 %v212_v33, %v198_v34  ;;  %v271_v36 = vpop.f32.mrb[1].mxu1 }
 0x1c4   :  { %203 = vst.msk [vmem:[%s367_s2] sm:$0xff] %vm202_vm3, %v199_v35 }
 0x1c5   :  { %208 = vsyncpa [#allocation3], 1 }

</bundles_post_ra>
